<compile_context>
chip_gen: v7x
topology: tpu7x:2x2x1
jax: 0.10.0
libtpu: 0.0.40
codegen_flags: <defaults>
</compile_context>

<pallas_src>
import math
import functools

import jax
import jax.numpy as jnp
from jax.experimental import pallas as pl
from jax.experimental.pallas import tpu as pltpu


def _round_up(x, m):
    return ((x + m - 1) // m) * m


def _arcface_kernel(pred_ref, tgtcos_ref, loss_ref, m_scr, l_scr, *,
                    s, cos_m, sin_m, mm, threshold, n_pad_cols, compute_dtype):
    """One (TN, TC) tile of the ArcFace soft-CE with online softmax over C."""
    j = pl.program_id(1)

    # ---- init carried stats at the first class tile of every row tile ----
    @pl.when(j == 0)
    def _():
        m_scr[...] = jnp.full_like(m_scr, -jnp.inf)   # running row max (f32)
        l_scr[...] = jnp.zeros_like(l_scr)            # running exp-sum (f32)

    # ---- unmodified logits for this tile -----------------------------------
    # compute_dtype=bf16 doubles VALU throughput of this (binding) dense chain
    # on v6e/v7x; the reductions / carried stats stay f32.
    z = s * jnp.clip(pred_ref[...].astype(compute_dtype), -1.0, 1.0)

    # ---- online softmax update (no target handling in the hot loop) --------
    m_prev = m_scr[...]
    m_tile = jnp.max(z, axis=-1, keepdims=True).astype(jnp.float32)
    m_new = jnp.maximum(m_prev, m_tile)
    p = jnp.exp(z - m_new.astype(compute_dtype))
    l_scr[...] = (jnp.exp(m_prev - m_new) * l_scr[...]
                  + jnp.sum(p.astype(jnp.float32), axis=-1, keepdims=True))
    m_scr[...] = m_new

    # ---- finalize on the last class tile ------------------------------------
    @pl.when(j == pl.num_programs(1) - 1)
    def _():
        m_run = m_scr[...]                                        # (tn, 1) f32
        tgt_cos = jnp.clip(tgtcos_ref[...].astype(jnp.float32), -1.0, 1.0)

        # ArcFace margin only on the (tn, 1) target cosines:
        # cos(acos(x) + m) == x*cos(m) - sqrt(1 - x^2)*sin(m)  for x in [-1, 1]
        sin_t = jnp.sqrt(jnp.maximum(1.0 - tgt_cos * tgt_cos, 0.0))
        cos_tm = tgt_cos * cos_m - sin_t * sin_m
        cos_tm = jnp.where(tgt_cos > threshold, cos_tm, tgt_cos - mm)
        z_tgt = s * cos_tm                                        # (tn, 1)

        l = l_scr[...]
        if n_pad_cols:
            # Padded columns were filled with -1.0 -> each contributed exactly
            # exp(-s - m_run); remove that known mass analytically.
            l = l - n_pad_cols * jnp.exp(-s - m_run)
        # Swap the unmodified target term for the margin-modified one.  Valid
        # because the margin never raises the target logit, so m_run still
        # dominates all modified logits.
        tgt_term = jnp.exp(z_tgt - m_run)
        l = l - jnp.exp(s * tgt_cos - m_run) + tgt_term
        l = jnp.maximum(l, tgt_term)   # true l >= tgt_term; guards cancellation

        loss = m_run + jnp.log(l) - z_tgt                         # lse - z_tgt
        # Lane-dense store (unmasked full-lane vst); wrapper reads column 0.
        loss_ref[...] = jnp.broadcast_to(loss, loss_ref.shape)


def arcface_loss(pred, target, *, s=30.0, m=0.5, reduction="mean",
                 loss_weight=1.0, row_tile=256, col_tile=4096,
                 compute_dtype=jnp.float32, stream_dtype=None):
    """ArcFace loss matching the PyTorch module (weight/class_weight=None)."""
    n, c = pred.shape
    target = target.astype(jnp.int32)
    row_tile = _round_up(max(row_tile, 8), 8)
    col_tile = _round_up(max(col_tile, 128), 128)

    if stream_dtype is not None and pred.dtype != stream_dtype:
        # Halves HBM traffic on memory-bound parts (v5e) when precision permits.
        pred = pred.astype(stream_dtype)

    # Gather the per-row target cosine up front; the kernel never sees the
    # integer labels.  (Out-of-range labels are not supported — same as the
    # reference one_hot path, valid labels in [0, C) are assumed.)
    tgt_cos = jnp.take_along_axis(pred, target[:, None], axis=1)
    tgt_cos = tgt_cos.astype(jnp.float32)

    # Tile selection: keep >= 2 row blocks whenever the batch allows so both
    # TensorCores get work on megacore (v7x) parts.
    tn = min(row_tile, max(8, _round_up((n + 1) // 2, 8)))
    tc = min(col_tile, _round_up(c, 128))
    n_pad = _round_up(n, tn)
    c_pad = _round_up(c, tc)

    pred_p = pred
    if (n_pad, c_pad) != (n, c):
        # Pad with -1.0: padded columns clip to exactly -1 (logit == -s) and
        # their mass is removed analytically at finalize; padded rows are
        # sliced off below.
        pred_p = jnp.pad(pred, ((0, n_pad - n), (0, c_pad - c)),
                         constant_values=-1.0)
    if n_pad != n:
        tgt_cos = jnp.pad(tgt_cos, ((0, n_pad - n), (0, 0)),
                          constant_values=-1.0)

    kernel = functools.partial(
        _arcface_kernel,
        s=float(s),
        cos_m=math.cos(m),
        sin_m=math.sin(m),
        mm=math.sin(math.pi - m) * m,
        threshold=math.cos(math.pi - m),
        n_pad_cols=c_pad - c,
        compute_dtype=compute_dtype,
    )

    grid = (n_pad // tn, c_pad // tc)

    # VMEM budget: 2x double-buffered input tiles + ~5 full-tile f32
    # intermediates + lane-padded (tn,128) scratch/output.  Clamp so the
    # request stays within every generation's physical VMEM (v7x: 64 MiB).
    in_bytes = jnp.dtype(pred_p.dtype).itemsize
    vmem_bytes = 2 * tn * tc * in_bytes + 5 * tn * tc * 4 + (2 << 20)
    vmem_bytes = int(min(max(vmem_bytes, 32 << 20), 64 << 20))

    out = pl.pallas_call(
        kernel,
        out_shape=jax.ShapeDtypeStruct((n_pad, 128), jnp.float32),
        grid_spec=pltpu.PrefetchScalarGridSpec(
            num_scalar_prefetch=0,
            grid=grid,
            in_specs=[
                pl.BlockSpec((tn, tc), lambda i, j: (i, j)),   # pred tile
                pl.BlockSpec((tn, 1), lambda i, j: (i, 0)),    # target cosine
            ],
            out_specs=pl.BlockSpec((tn, 128), lambda i, j: (i, 0)),
            scratch_shapes=[
                pltpu.VMEM((tn, 1), jnp.float32),   # running max
                pltpu.VMEM((tn, 1), jnp.float32),   # running exp-sum
            ],
        ),
        compiler_params=pltpu.CompilerParams(
            dimension_semantics=("parallel", "arbitrary"),
            vmem_limit_bytes=vmem_bytes),
    )(pred_p, tgt_cos)

    per_sample = out[:n, 0]

    # TODO(synk): per-sample `weight`, `class_weight` and `avg_factor` paths
    # (defaults None in the module) are not implemented; only the default
    # reduction logic is.
    if reduction == "mean":
        loss = jnp.mean(per_sample)
    elif reduction == "sum":
        loss = jnp.sum(per_sample)
    else:  # "none"
        loss = per_sample
    return loss_weight * loss


def _reference(pred, target, *, s=30.0, m=0.5):
    """Pure-JAX reference mirroring the PyTorch forward."""
    mm = math.sin(math.pi - m) * m
    threshold = math.cos(math.pi - m)
    one_hot = jax.nn.one_hot(target, pred.shape[-1], dtype=jnp.float32)
    cos_t = jnp.clip(pred.astype(jnp.float32), -1.0, 1.0)
    cos_t_m = jnp.cos(jnp.arccos(cos_t) + m)
    cos_t_m = jnp.where(cos_t > threshold, cos_t_m, cos_t - mm)
    logit = (one_hot * cos_t_m + (1.0 - one_hot) * cos_t) * s
    log_sm = jax.nn.log_softmax(logit, axis=-1)
    return jnp.mean(-jnp.sum(one_hot * log_sm, axis=-1))


if __name__ == "__main__":
    key = jax.random.PRNGKey(0)
    k1, k2 = jax.random.split(key)

    # Small demo: 12 samples x 300 classes.  col_tile=128 forces a multi-tile
    # online softmax plus ragged class padding (300 -> 384) and ragged row
    # padding (12 -> 16 with tn=8, i.e. 2 row blocks on the parallel axis).
    N, C = 12, 300
    pred = jnp.tanh(jax.random.normal(k1, (N, C), dtype=jnp.float32))
    target = jax.random.randint(k2, (N,), 0, C, dtype=jnp.int32)

    ref = _reference(pred, target)

    # Default f32 compute path, multi-tile class sweep.
    loss = arcface_loss(pred, target, col_tile=128)
    jax.block_until_ready(loss)
    assert jnp.allclose(loss, ref, rtol=5e-4, atol=5e-4), (loss, ref)

    # Single-class-tile path (init + update + finalize in one grid step).
    loss_one = arcface_loss(pred, target)
    jax.block_until_ready(loss_one)
    assert jnp.allclose(loss_one, ref, rtol=5e-4, atol=5e-4), (loss_one, ref)

    # bf16 compute + bf16 streaming path (v6e/v7x VALU / v5e HBM tuning);
    # reduced precision, so only a loose check.
    loss_bf16 = arcface_loss(pred, target, col_tile=128,
                             compute_dtype=jnp.bfloat16,
                             stream_dtype=jnp.bfloat16)
    jax.block_until_ready(loss_bf16)
    assert bool(jnp.isfinite(loss_bf16)) and float(jnp.abs(loss_bf16 - ref)) < 0.3, (
        loss_bf16, ref)

    print("KERNEL_OK")
</pallas_src>

<mosaic_0001>
module attributes {stable_mosaic.version = 11 : i64} {
  func.func @_arcface_kernel(%arg0: i32, %arg1: i32, %arg2: memref<8x128xf32, #tpu.memory_space<vmem>>, %arg3: memref<8x1xf32, #tpu.memory_space<vmem>>, %arg4: memref<8x128xf32, #tpu.memory_space<vmem>>, %arg5: memref<8x1xf32, #tpu.memory_space<vmem>>, %arg6: memref<8x1xf32, #tpu.memory_space<vmem>>) attributes {dimension_semantics = [#tpu.dimension_semantics<parallel>, #tpu.dimension_semantics<arbitrary>], iteration_bounds = array<i64: 2, 3>, scalar_prefetch = 0 : i64, scratch_operands = 2 : i64, tpu.core_type = #tpu.core_type<tc>, window_params = [{transform_indices = @transform_0, window_bounds = array<i64: 8, 128>}, {transform_indices = @transform_1, window_bounds = array<i64: 8, 1>}, {transform_indices = @transform_2, window_bounds = array<i64: 8, 128>}]} {
    %c0_i32 = arith.constant 0 : i32
    %0 = arith.cmpi eq, %arg1, %c0_i32 : i32
    %1 = arith.extui %0 : i1 to i32
    %c0_i32_0 = arith.constant 0 : i32
    %2 = arith.cmpi ne, %1, %c0_i32_0 : i32
    scf.if %2 {
      %cst_15 = arith.constant 0xFF800000 : f32
      %29 = vector.broadcast %cst_15 : f32 to vector<8x1xf32>
      %c0_16 = arith.constant 0 : index
      %c0_17 = arith.constant 0 : index
      %30 = vector.load %arg5[%c0_16, %c0_17] : memref<8x1xf32, #tpu.memory_space<vmem>>, vector<8x1xf32>
      tpu.vector_store %arg5[%c0_16, %c0_17], %29 {strides = array<i32>} : memref<8x1xf32, #tpu.memory_space<vmem>>, vector<8x1xf32>,
      %cst_18 = arith.constant 0.000000e+00 : f32
      %31 = vector.broadcast %cst_18 : f32 to vector<8x1xf32>
      %c0_19 = arith.constant 0 : index
      %c0_20 = arith.constant 0 : index
      %32 = vector.load %arg6[%c0_19, %c0_20] : memref<8x1xf32, #tpu.memory_space<vmem>>, vector<8x1xf32>
      tpu.vector_store %arg6[%c0_19, %c0_20], %31 {strides = array<i32>} : memref<8x1xf32, #tpu.memory_space<vmem>>, vector<8x1xf32>,
    } else {
    }
    %c0 = arith.constant 0 : index
    %c0_1 = arith.constant 0 : index
    %3 = vector.load %arg2[%c0, %c0_1] : memref<8x128xf32, #tpu.memory_space<vmem>>, vector<8x128xf32>
    %cst = arith.constant -1.000000e+00 : f32
    %cst_2 = arith.constant 1.000000e+00 : f32
    %4 = vector.broadcast %cst : f32 to vector<8x128xf32>
    %5 = arith.maximumf %4, %3 : vector<8x128xf32>
    %6 = vector.broadcast %cst_2 : f32 to vector<8x128xf32>
    %7 = arith.minimumf %6, %5 : vector<8x128xf32>
    %cst_3 = arith.constant 3.000000e+01 : f32
    %8 = vector.broadcast %cst_3 : f32 to vector<8x128xf32>
    %9 = arith.mulf %8, %7 : vector<8x128xf32>
    %c0_4 = arith.constant 0 : index
    %c0_5 = arith.constant 0 : index
    %10 = vector.load %arg5[%c0_4, %c0_5] : memref<8x1xf32, #tpu.memory_space<vmem>>, vector<8x1xf32>
    %cst_6 = arith.constant dense<0xFF800000> : vector<8xf32>
    %11 = vector.multi_reduction <maximumf>, %9, %cst_6 [1] : vector<8x128xf32> to vector<8xf32>
    %12 = vector.shape_cast %11 : vector<8xf32> to vector<8x1xf32>
    %13 = arith.maximumf %10, %12 : vector<8x1xf32>
    %14 = vector.broadcast %13 : vector<8x1xf32> to vector<8x128xf32>
    %15 = arith.subf %9, %14 : vector<8x128xf32>
    %16 = math.exp %15 : vector<8x128xf32>
    %17 = arith.subf %10, %13 : vector<8x1xf32>
    %18 = math.exp %17 : vector<8x1xf32>
    %c0_7 = arith.constant 0 : index
    %c0_8 = arith.constant 0 : index
    %19 = vector.load %arg6[%c0_7, %c0_8] : memref<8x1xf32, #tpu.memory_space<vmem>>, vector<8x1xf32>
    %20 = arith.mulf %18, %19 : vector<8x1xf32>
    %cst_9 = arith.constant dense<0.000000e+00> : vector<8xf32>
    %21 = vector.multi_reduction <add>, %16, %cst_9 [1] : vector<8x128xf32> to vector<8xf32>
    %22 = vector.shape_cast %21 : vector<8xf32> to vector<8x1xf32>
    %23 = arith.addf %20, %22 : vector<8x1xf32>
    %c0_10 = arith.constant 0 : index
    %c0_11 = arith.constant 0 : index
    %24 = vector.load %arg6[%c0_10, %c0_11] : memref<8x1xf32, #tpu.memory_space<vmem>>, vector<8x1xf32>
    tpu.vector_store %arg6[%c0_10, %c0_11], %23 {strides = array<i32>} : memref<8x1xf32, #tpu.memory_space<vmem>>, vector<8x1xf32>,
    %c0_12 = arith.constant 0 : index
    %c0_13 = arith.constant 0 : index
    %25 = vector.load %arg5[%c0_12, %c0_13] : memref<8x1xf32, #tpu.memory_space<vmem>>, vector<8x1xf32>
    tpu.vector_store %arg5[%c0_12, %c0_13], %13 {strides = array<i32>} : memref<8x1xf32, #tpu.memory_space<vmem>>, vector<8x1xf32>,
    %c2_i32 = arith.constant 2 : i32
    %26 = arith.cmpi eq, %arg1, %c2_i32 : i32
    %27 = arith.extui %26 : i1 to i32
    %c0_i32_14 = arith.constant 0 : i32
    %28 = arith.cmpi ne, %27, %c0_i32_14 : i32
    scf.if %28 {
      %c0_15 = arith.constant 0 : index
      %c0_16 = arith.constant 0 : index
      %29 = vector.load %arg5[%c0_15, %c0_16] : memref<8x1xf32, #tpu.memory_space<vmem>>, vector<8x1xf32>
      %c0_17 = arith.constant 0 : index
      %c0_18 = arith.constant 0 : index
      %30 = vector.load %arg3[%c0_17, %c0_18] : memref<8x1xf32, #tpu.memory_space<vmem>>, vector<8x1xf32>
      %cst_19 = arith.constant -1.000000e+00 : f32
      %cst_20 = arith.constant 1.000000e+00 : f32
      %31 = vector.broadcast %cst_19 : f32 to vector<8x1xf32>
      %32 = arith.maximumf %31, %30 : vector<8x1xf32>
      %33 = vector.broadcast %cst_20 : f32 to vector<8x1xf32>
      %34 = arith.minimumf %33, %32 : vector<8x1xf32>
      %35 = arith.mulf %34, %34 : vector<8x1xf32>
      %cst_21 = arith.constant 1.000000e+00 : f32
      %36 = vector.broadcast %cst_21 : f32 to vector<8x1xf32>
      %37 = arith.subf %36, %35 : vector<8x1xf32>
      %cst_22 = arith.constant 0.000000e+00 : f32
      %38 = vector.broadcast %cst_22 : f32 to vector<8x1xf32>
      %39 = arith.maximumf %37, %38 : vector<8x1xf32>
      %40 = math.sqrt %39 : vector<8x1xf32>
      %cst_23 = arith.constant 0.87758255 : f32
      %41 = vector.broadcast %cst_23 : f32 to vector<8x1xf32>
      %42 = arith.mulf %34, %41 : vector<8x1xf32>
      %cst_24 = arith.constant 0.47942555 : f32
      %43 = vector.broadcast %cst_24 : f32 to vector<8x1xf32>
      %44 = arith.mulf %40, %43 : vector<8x1xf32>
      %45 = arith.subf %42, %44 : vector<8x1xf32>
      %cst_25 = arith.constant -0.87758255 : f32
      %46 = vector.broadcast %cst_25 : f32 to vector<8x1xf32>
      %47 = arith.cmpf ogt, %34, %46 : vector<8x1xf32>
      %cst_26 = arith.constant 0.239712775 : f32
      %48 = vector.broadcast %cst_26 : f32 to vector<8x1xf32>
      %49 = arith.subf %34, %48 : vector<8x1xf32>
      %50 = arith.select %47, %45, %49 : vector<8x1xi1>, vector<8x1xf32>
      %cst_27 = arith.constant 3.000000e+01 : f32
      %51 = vector.broadcast %cst_27 : f32 to vector<8x1xf32>
      %52 = arith.mulf %51, %50 : vector<8x1xf32>
      %c0_28 = arith.constant 0 : index
      %c0_29 = arith.constant 0 : index
      %53 = vector.load %arg6[%c0_28, %c0_29] : memref<8x1xf32, #tpu.memory_space<vmem>>, vector<8x1xf32>
      %cst_30 = arith.constant -3.000000e+01 : f32
      %54 = vector.broadcast %cst_30 : f32 to vector<8x1xf32>
      %55 = arith.subf %54, %29 : vector<8x1xf32>
      %56 = math.exp %55 : vector<8x1xf32>
      %cst_31 = arith.constant 8.400000e+01 : f32
      %57 = vector.broadcast %cst_31 : f32 to vector<8x1xf32>
      %58 = arith.mulf %57, %56 : vector<8x1xf32>
      %59 = arith.subf %53, %58 : vector<8x1xf32>
      %60 = arith.subf %52, %29 : vector<8x1xf32>
      %61 = math.exp %60 : vector<8x1xf32>
      %cst_32 = arith.constant 3.000000e+01 : f32
      %62 = vector.broadcast %cst_32 : f32 to vector<8x1xf32>
      %63 = arith.mulf %62, %34 : vector<8x1xf32>
      %64 = arith.subf %63, %29 : vector<8x1xf32>
      %65 = math.exp %64 : vector<8x1xf32>
      %66 = arith.subf %59, %65 : vector<8x1xf32>
      %67 = arith.addf %66, %61 : vector<8x1xf32>
      %68 = arith.maximumf %67, %61 : vector<8x1xf32>
      %69 = math.log %68 : vector<8x1xf32>
      %70 = arith.addf %29, %69 : vector<8x1xf32>
      %71 = arith.subf %70, %52 : vector<8x1xf32>
      %72 = vector.shape_cast %71 : vector<8x1xf32> to vector<8x1xf32>
      %73 = vector.broadcast %72 : vector<8x1xf32> to vector<8x128xf32>
      %c0_33 = arith.constant 0 : index
      %c0_34 = arith.constant 0 : index
      %74 = vector.load %arg4[%c0_33, %c0_34] : memref<8x128xf32, #tpu.memory_space<vmem>>, vector<8x128xf32>
      tpu.vector_store %arg4[%c0_33, %c0_34], %73 {strides = array<i32>} : memref<8x128xf32, #tpu.memory_space<vmem>>, vector<8x128xf32>,
    } else {
    }
    return
  }
  func.func @transform_0(%arg0: i32, %arg1: i32) -> (i32, i32) {
    %c0_i32 = arith.constant 0 : i32
    return %arg0, %arg1 : i32, i32
  }
  func.func @transform_1(%arg0: i32, %arg1: i32) -> (i32, i32) {
    %c0_i32 = arith.constant 0 : i32
    %c0_i32_0 = arith.constant 0 : i32
    return %arg0, %c0_i32 : i32, i32
  }
  func.func @transform_2(%arg0: i32, %arg1: i32) -> (i32, i32) {
    %c0_i32 = arith.constant 0 : i32
    %c0_i32_0 = arith.constant 0 : i32
    return %arg0, %c0_i32 : i32, i32
  }
}

</mosaic_0001>

<bundles_post_ra>
// kernel: tpu_custom_call.1
= control target key start
LH: loop header
LB: loop body
LE: loop exit
PB: predicated region body
PF: predicated region fallthrough
CT: control target
= control target key end

     0   :  { %7 = vsyncpa [#allocation5], 0  ;;  %s936_s0 = inlined_call_operand.hbm [shape: f32[16,384], index: 0, kind: input, shape index: {}]   ;;  %s937_s1 = inlined_call_operand.vmem [shape: f32[16,1], index: 1, kind: input, shape index: {}]   ;;  %s938_s2 = inlined_call_operand.hbm [shape: f32[16,128], index: 2, kind: output, shape index: {}]  }
   0x1   :  { %9 = vsyncpa [#allocation5 + $0x1], 0 }
   0x2   :  { %10 = vsyncpa [#allocation6], 0 }
   0x3   :  { %12 = vsyncpa [#allocation6 + $0x1], 0  ;;  %s703_s9 = smov 0   ;;  %s705_s10 = smov 0  }
   0x4   :  { %s707_s11 = smov 0   ;;  %s709_s12 = smov 0  }
   0x5   :  { %s711_s13 = smov 0   ;;  %s713_s14 = smov 0  }
   0x6   :  { %s715_s15 = smov 0   ;;  %s717_s16 = smov 0  }
   0x7   :  { %s719_s17 = smov 0   ;;  %s721_s18 = smov 0  }
   0x8   :  { %s723_s19 = smov 0  }
   0x9 LB: > { %s386_s20 = sadd.s32 4294967295, %s680_s19   ;;  %s387_s21 = sadd.s32 4294967294, %s680_s19   ;;  %s680_s19 = sphi %s723_s19, %s18_s19   ;;  %s676_s18 = sphi %s721_s18, %s960_s18   ;;  %s672_s17 = sphi %s719_s17, %s959_s17   ;;  %s668_s16 = sphi %s717_s16, %s958_s16   ;;  %s664_s15 = sphi %s715_s15, %s957_s15   ;;  %s660_s14 = sphi %s713_s14, %s956_s14   ;;  %s656_s13 = sphi %s711_s13, %s955_s13   ;;  %s652_s12 = sphi %s709_s12, %s954_s12   ;;  %s648_s11 = sphi %s707_s11, %s953_s11   ;;  %s644_s10 = sphi %s705_s10, %s952_s10   ;;  %s640_s9 = sphi %s703_s9, %s951_s9  }
   0xa   : > { %s27_s22 = sadd.s32 1, %s672_s17  ;;  %s30_s23 = sadd.s32 1, %s676_s18 }
   0xb   : > { %p28_p0 = scmp.ge.s32.totalorder %s27_s22, 3  ;;  %s39_s24 = sadd.s32 1, %s660_s14 }
   0xc   : > { %p46_p1 = scmp.ne.s32.totalorder %s660_s14, %s656_s13  ;;  %p47_p2 = scmp.eq.s32.totalorder %s680_s19, 0 }
   0xd   : > { %s962_s22 = smov (%p28_p0, %s27_s22), 0  ;;  %s964_s23 = smov (!%p28_p0, %s30_s23), %s676_s18 }
   0xe   : > { %s35_s25 = ssub.s32 %s672_s17, %s962_s22  ;;  %p769_p3 = por %p47_p2, %p46_p1 }
   0xf   : > { %p32_p4 = scmp.ge.s32.totalorder %s964_s23, 2  ;;  %p52_p5 = scmp.ne.s32.totalorder %s656_s13, %s652_s12 }
  0x10   : > { %p53_p6 = scmp.eq.s32.totalorder %s386_s20, 0  ;;  %s91_s27 = sadd.s32 1, %s648_s11 }
  0x11   : > { %s966_s23 = smov (%p32_p4, %s964_s23), 0  ;;  %p101_p8 = scmp.ne.s32.totalorder %s648_s11, %s644_s10 }
  0x12   : > { %942 = sst [smem:[#allocation10_spill]] %s966_s23  ;;  %p777_p7 = por %p53_p6, %p52_p5 }
  0x13   : > { %s34_s29 = ssub.s32 %s676_s18, %s966_s23  ;;  %p102_p9 = scmp.eq.s32.totalorder %s386_s20, 5 }
  0x14   : > { %s36_s30 = sor.u32 %s35_s25, %s34_s29  ;;  %p89_p10 = scmp.eq.s32.totalorder %s34_s29, 0 }
  0x15   : > { %p37_p11 = scmp.eq.s32.totalorder %s36_s30, 0  ;;  %p785_p12 = por %p102_p9, %p101_p8 }
  0x16   : > { %s790_s4 = scalar_select %p89_p10, %s648_s11, %s91_s27  }
  0x17   : > { %s944_s3 = scalar_select %p785_p12, 1, 0 }
  0x18   : > { %s793_s5 = scalar_select %p37_p11, %s660_s14, %s39_s24  }
  0x19   : > { %p107_p13 = scmp.ne.s32.totalorder %s644_s10, %s640_s9  ;;  %p108_p0 = scmp.eq.s32.totalorder %s387_s21, 5 }
  0x1a   : > { %p418_p1 = scmp.lt.s32.totalorder %s680_s19, 6  ;;  %s128_s7 = sand.u32 1, %s660_s14  }
  0x1b   : > { %p798_p2 = por %p108_p0, %p107_p13  ;;  %s390_s8 = sshll.u32 %s128_s7, 3 }
  0x1c   : > { %s405_s12 = smul.u32 3, %s676_s18  ;;  %s132_s20 = scalar_lea.vmem [#allocation4], %s390_s8 }
  0x1d   : > { %s945_s6 = scalar_select %p798_p2, 1, 0 }
  0x1e   : > { %s141_s25 = sshll.u32 %s132_s20, 4  ;;  %p806_p4 = pnand %p418_p1, %p769_p3  ;;  %s811_s25 = int_to_ptr.vmem [resolvable:$true] %s141_s25 }
  0x1f   : > { %s137_s24 = sadd.s32 %s672_s17, %s405_s12  ;;  %s129_s26 = scalar_lea.sflag [#allocation5], %s128_s7 }
  0x20   : > { %s391_s21 = sshll.u32 %s137_s24, 7  ;;  %p530_p6 = pneg %p806_p4 }
  0x21   : > { %s816_s23 = scalar_lea.hbm %s936_s0, %s391_s21  ;;  %s533_s24 = scalar_lea.hbm %s936_s0, 768 }
  0x22   : > { %s528_s8 = scalar_lea.hbm %s816_s23, 128  ;;  %p534_p10 = scmp.lt.u32.totalorder %s816_s23, %s936_s0 }
  0x23   : > { %p529_p3 = scmp.ne.s32.totalorder %s816_s23, %s528_s8  ;;  %p535_p11 = scmp.lt.u32.totalorder %s533_s24, %s528_s8 }
  0x24   : > { %p537_p0 = scmp.lt.u32.totalorder %s528_s8, %s816_s23 }
  0x25   : > { %p531_p8 = pnand %p530_p6, %p529_p3  ;;  %p536_p13 = por %p535_p11, %p534_p10 }
  0x27   : > { %p532_p9 = pneg %p531_p8  ;;  %p538_p1 = por %p537_p0, %p536_p13 }
  0x29   : > { %p539_p5 = pnand %p538_p1, %p532_p9 }
  0x2b   : > { %542 = shalt.err (!%p539_p5)
}
  0x2c   : > { %s543_s7 = scalar_lea.vmem %s811_s25, 128  ;;  %s682_s30 = smov [#allocation4]  }
  0x2d   : > { %p544_p3 = scmp.ne.s32.totalorder %s811_s25, %s543_s7  ;;  %s548_s12 = sshll.u32 %s682_s30, 4  ;;  %s549_s12 = int_to_ptr.vmem [resolvable:$false] %s548_s12 }
  0x2e   : > { %s550_s20 = scalar_lea.vmem %s549_s12, 256  ;;  %p551_p12 = scmp.lt.s32.totalorder %s811_s25, %s549_s12 }
  0x2f   : > { %p546_p8 = pnand %p544_p3, %p530_p6  ;;  %p552_p10 = scmp.lt.s32.totalorder %s550_s20, %s543_s7 }
  0x31   : > { %p547_p2 = pneg %p546_p8  ;;  %p553_p11 = por %p552_p10, %p551_p12 }
  0x33   : > { %p554_p13 = pnand %p553_p11, %p547_p2 }
  0x35   : > { %557 = shalt.err (!%p554_p13)
}
  0x36   : > { %413 = dma.hbm_to_vmem [thread:$0]  (!%p806_p4), %s816_s23, 128, %s811_s25, %s129_s26  }
  0x37   : > { %p153_p5 = scmp.lt.s32.totalorder %s680_s19, 7  ;;  %p947_p9 = scmp.ge.s32.totalorder %s680_s19, 1 }
  0x39   : > { %p154_p6 = pnand %p947_p9, %p153_p5 }
  0x3a   : > { %s159_s8 = sand.u32 (!%p154_p6), 1, %s656_s13  }
  0x3b   : > { %157 = sbr.rel (%p154_p6) target bundleno = 700 (0x2bc), region = 28  ;;  %s393_s24 = sshll.u32 (!%p154_p6), %s159_s8, 3 }
  0x3c   : > { %s160_s21 = scalar_lea.sflag (!%p154_p6), [#allocation5], %s159_s8  ;;  %s163_s27 = scalar_lea.vmem (!%p154_p6), [#allocation4], %s393_s24 }
  0x42   : > { %631 = dma.done.wait (%p777_p7), %s160_s21, 128  }
  0x43   : > { %633 = vsyncadd (%p777_p7), %s160_s21, 4294967168  ;;  %s185_s23 = sand.u32 1, %s644_s10   ;;  %p188_p12 = scmp.lt.s32.totalorder %s668_s16, 1 }
  0x44   : > { %s856_s25 = sshll.u32 %s185_s23, 3  ;;  %p396_p7 = scmp.ne.s32.totalorder %s664_s15, 0 }
  0x45   : > { %s189_s29 = scalar_select %p188_p12, %s668_s16, 1 }
  0x46   : > { %s187_s20 = scalar_lea.vmem [#allocation7], %s856_s25  ;;  %195 = sbr.rel (%p396_p7) target bundleno = 77 (0x4d), region = 36  ;;  %vm196_vm0 = vcmask (!%p396_p7), 7168   ;;  %v683_v0 = vmov (!%p396_p7), -inf   ;;  %v684_v1 = vmov (!%p396_p7), 0.0  }
  0x47   : > { %s395_s26 = sshll.u32 %s189_s29, 3  ;;  %197 = vst.msk [vmem:[#allocation2] sm:$0xff] (!%p396_p7), %vm196_vm0, %v683_v0  ;;  %198 = vst.msk [vmem:[#allocation3] sm:$0xff] (!%p396_p7), %vm196_vm0, %v684_v1 }
  0x48   : > { %s862_s12 = scalar_lea.vmem %s937_s1, %s395_s26 }
  0x4d PF: > { %v199_v2 = vld [vmem:[%s163_s27] sm:$0xff]  ;;  %v685_v5 = vmov 0   ;;  %vm223_vm1 = vcmask 7168   ;;  %p398_p2 = scmp.ne.s32.totalorder %s664_s15, 2 }
  0x4e   : > { %v397_v3 = vclamps-f32 %v199_v2, 1.0  ;;  %512 = vset.pattern.permute.xlu0 %v685_v5  ;;  %v203_v6 = vld [vmem:[#allocation2] sm:$0xff]  ;;  %v218_v16 = vld [vmem:[#allocation3] sm:$0xff]  ;;  %v686_v21 = vmov (!%p398_p2), 0  }
  0x4f   : > { %v231_v20 = vld [vmem:[%s862_s12] sm:$0xff] (!%p398_p2) }
  0x50   : > { %v202_v4 = vmul.f32 30.0, %v397_v3  ;;  %v399_v22 = vclamps-f32 (!%p398_p2), %v231_v20, 1.0 }
  0x52   : > { %204 = vmax.xlane.f32.xlu0 %v202_v4  ;;  %v234_v23 = vmul.f32 (!%p398_p2), %v399_v22, %v399_v22  ;;  %v260_v29 = vmul.f32 (!%p398_p2), 30.0, %v399_v22  ;;  %v244_v35 = vmul.f32 (!%p398_p2), 0.87758255, %v399_v22  ;;  %v400_v38 = vadd.f32 (!%p398_p2), -0.23971277, %v399_v22 }
  0x53   : > { %vm247_vm4 = vcmp.gt.f32.partialorder (!%p398_p2), %v399_v22, -0.87758255 }
  0x54   : > { %v235_v24 = vsub.f32 (!%p398_p2), 1.0, %v234_v23 }
  0x56   : > { %v236_v25 = vmax.f32 (!%p398_p2), %v235_v24, 0.0 }
  0x58   : > { %vm239_vm2 = vcmp.eq.f32.partialorder (!%p398_p2), %v236_v25, inf  ;;  %v242_v31 = vand.u32 (!%p398_p2), 2147483648, %v236_v25  ;;  %vm241_vm3 = vcmp.eq.f32.partialorder (!%p398_p2), %v236_v25, 0.0 }
  0xdf   : > { %v205_v7 = vpop.xlane.xlu0 %204 }
  0xe0   : > { %v206_v8 = vmax.f32 %v203_v6, %v205_v7 }
  0xe2   : > { %v215_v9 = vsub.f32 %v203_v6, %v206_v8  ;;  %225 = vst.msk [vmem:[#allocation2] sm:$0xff] %vm223_vm1, %v206_v8  ;;  %209 = vperm.xlu0 %512, %v206_v8  }
  0xe4   : > { %v216_v14 = vmul.f32 1.442695, %v215_v9 }
  0xe6   : > { %517 = vset.pattern.permute.xlu0 (!%p398_p2), %v686_v21 }
  0xe9   : > { %v230_v26 = vld [vmem:[#allocation2] sm:$0xff] (!%p398_p2) }
  0xea   : > { %v252_v27 = vsub.f32 (!%p398_p2), -30.0, %v230_v26  ;;  %v261_v33 = vsub.f32 (!%p398_p2), %v260_v29, %v230_v26 }
  0xec   : > { %v253_v28 = vmul.f32 (!%p398_p2), 1.442695, %v252_v27  ;;  %v262_v39 = vmul.f32 (!%p398_p2), 1.442695, %v261_v33 }
 0x161   : > { %v210_v10 = vpop.permute.xlu0 %209 }
 0x162   : > { %v212_v11 = vsub.f32 %v202_v4, %v210_v10 }
 0x164   : > { %v213_v12 = vmul.f32 1.442695, %v212_v11 }
 0x166   : > { %513 = vpow2.f32 %v213_v12 }
 0x167   : > { %515 = vpow2.f32 %v216_v14 }
 0x168   : > { %518 = vrsqrt.f32 (!%p398_p2), %v236_v25 }
 0x169   : > { %520 = vpow2.f32 (!%p398_p2), %v253_v28 }
 0x16a   : > { %522 = vpow2.f32 (!%p398_p2), %v262_v39 }
 0x170   : > { %v514_v13 = vpop.eup %513 }
 0x171   : > { %220 = vadd.xlane.f32.xlu1 %v514_v13  ;;  %v516_v15 = vpop.eup %515 }
 0x172   : > { %v219_v17 = vmul.f32 %v516_v15, %v218_v16  ;;  %v519_v30 = vpop.eup (!%p398_p2), %518 }
 0x173   : > { %v238_v32 = vmul.f32 (!%p398_p2), %v519_v30, %v236_v25  ;;  %v521_v43 = vpop.eup (!%p398_p2), %520 }
 0x174   : > { %v255_v46 = vmul.f32 (!%p398_p2), 84.0, %v521_v43  ;;  %v523_v49 = vpop.eup (!%p398_p2), %522 }
 0x175   : > { %v240_v34 = vsel (!%p398_p2), %vm239_vm2, %v236_v25, %v238_v32 }
 0x176   : > { %v243_v36 = vsel (!%p398_p2), %vm241_vm3, %v242_v31, %v240_v34 }
 0x177   : > { %v245_v37 = vmul.f32 (!%p398_p2), 0.47942555, %v243_v36 }
 0x179   : > { %v246_v40 = vsub.f32 (!%p398_p2), %v244_v35, %v245_v37 }
 0x17b   : > { %v249_v41 = vsel (!%p398_p2), %vm247_vm4, %v246_v40, %v400_v38 }
 0x17c   : > { %v250_v42 = vmul.f32 (!%p398_p2), 30.0, %v249_v41 }
 0x17e   : > { %v257_v44 = vsub.f32 (!%p398_p2), %v250_v42, %v230_v26 }
 0x180   : > { %v258_v45 = vmul.f32 (!%p398_p2), 1.442695, %v257_v44 }
 0x182   : > { %524 = vpow2.f32 (!%p398_p2), %v258_v45 }
 0x18c   : > { %v525_v51 = vpop.eup (!%p398_p2), %524 }
 0x1fb   : > { %229 = sbr.rel (%p398_p2) target bundleno = 675 (0x2a3), region = 40 }
 0x1fe   : > { %v221_v18 = vpop.xlane.xlu1 %220 }
 0x1ff   : > { %v222_v19 = vadd.f32 %v221_v18, %v219_v17 }
 0x201   : > { %224 = vst.msk [vmem:[#allocation3] sm:$0xff] %vm223_vm1, %v222_v19 }
 0x208   : > { %v251_v47 = vld [vmem:[#allocation3] sm:$0xff] }
 0x209   : > { %v256_v48 = vsub.f32 %v251_v47, %v255_v46 }
 0x20b   : > { %v264_v50 = vsub.f32 %v256_v48, %v523_v49 }
 0x20d   : > { %v265_v52 = vadd.f32 %v525_v51, %v264_v50 }
 0x20f   : > { %v266_v53 = vmax.f32 %v265_v52, %v525_v51 }
 0x211   : > { %526 = vlog2.f32 %v266_v53 }
 0x21b   : > { %v527_v54 = vpop.eup %526 }
 0x21c   : > { %v268_v55 = vmul.f32 0.6931472, %v527_v54 }
 0x21e   : > { %v269_v56 = vadd.f32 %v268_v55, %v230_v26 }
 0x220   : > { %v270_v57 = vsub.f32 %v269_v56, %v250_v42 }
 0x222   : > { %273 = vperm.xlu0 %517, %v270_v57  }
 0x2a1   : > { %v274_v58 = vpop.permute.xlu0 %273 }
 0x2a2   : > { %276 = vst [vmem:[%s187_s20] sm:$0xff] %v274_v58 }
 0x2a3 PF: > { %s402_s15 = sshll.u32 %s668_s16, 7  ;;  %s291_s21 = sshll.u32 %s187_s20, 4  ;;  %s292_s21 = int_to_ptr.vmem [resolvable:$true] %s291_s21 }
 0x2a4   : > { %s876_s24 = scalar_lea.hbm %s938_s2, %s402_s15  ;;  %s278_s27 = scalar_lea.sflag [#allocation6], %s185_s23 }
 0x2a5   : > { %s558_s29 = scalar_lea.vmem %s292_s21, 128  ;;  %p948_p0 = scmp.ne.s32.totalorder %s944_s3, 0 }
 0x2a6   : > { %p559_p4 = scmp.ne.s32.totalorder %s292_s21, %s558_s29  ;;  %s687_s26 = smov [#allocation7]  }
 0x2a7   : > { %s562_s7 = sshll.u32 %s687_s26, 4  ;;  %s563_s7 = int_to_ptr.vmem [resolvable:$false] %s562_s7 }
 0x2a8   : > { %p560_p1 = pnand %p559_p4, %p948_p0  ;;  %s564_s30 = scalar_lea.vmem %s563_s7, 256 }
 0x2a9   : > { %p565_p8 = scmp.lt.s32.totalorder %s292_s21, %s563_s7  ;;  %p566_p10 = scmp.lt.s32.totalorder %s564_s30, %s558_s29 }
 0x2aa   : > { %p561_p3 = pneg %p560_p1 }
 0x2ab   : > { %p567_p11 = por %p566_p10, %p565_p8 }
 0x2ad   : > { %p568_p13 = pnand %p567_p11, %p561_p3 }
 0x2af   : > { %571 = shalt.err (!%p568_p13)
}
 0x2b0   : > { %s572_s16 = scalar_lea.hbm %s876_s24, 128  ;;  %s576_s12 = scalar_lea.hbm %s938_s2, 256 }
 0x2b1   : > { %p573_p5 = scmp.ne.s32.totalorder %s876_s24, %s572_s16  ;;  %p577_p12 = scmp.lt.u32.totalorder %s876_s24, %s938_s2 }
 0x2b2   : > { %p578_p7 = scmp.lt.u32.totalorder %s576_s12, %s572_s16  ;;  %p580_p4 = scmp.lt.u32.totalorder %s572_s16, %s876_s24 }
 0x2b3   : > { %p574_p9 = pnand %p573_p5, %p948_p0 }
 0x2b4   : > { %p579_p2 = por %p578_p7, %p577_p12 }
 0x2b5   : > { %p575_p6 = pneg %p574_p9 }
 0x2b6   : > { %p581_p1 = por %p580_p4, %p579_p2 }
 0x2b8   : > { %p582_p3 = pnand %p581_p1, %p575_p6 }
 0x2ba   : > { %585 = shalt.err (!%p582_p3)
}
 0x2bb   : > { %408 = dma.vmem_to_hbm [thread:$0]  (%p948_p0), %s292_s21, 128, %s876_s24, %s278_s27  }
 0x2bc PF: > { %p419_p8 = scmp.ge.s32.totalorder %s680_s19, 2  ;;  %s303_s28 = sand.u32 1, %s640_s9  }
 0x2bd   : > { %p949_p10 = scmp.ne.s32.totalorder %s945_s6, 0  ;;  %s304_s8 = scalar_lea.sflag [#allocation6], %s303_s28 }
 0x2bf   : > { %p415_p11 = pnand %p419_p8, %p949_p10 }
 0x2c1   : > { %635 = dma.done.wait (!%p415_p11), %s304_s8, 128  }
 0x2c2   : > { %637 = vsyncadd (!%p415_p11), %s304_s8, 4294967168  ;;  %s18_s19 = sadd.s32 1, %s680_s19   ;;  %s950_s3 = sld [smem:[#allocation10_spill]] }
 0x2c3   : > { %p15_p13 = scmp.ge.s32.totalorder %s18_s19, 8   ;;  %s951_s9 = smov %s644_s10 }
 0x2c4   : > { %s952_s10 = smov %s648_s11  ;;  %s953_s11 = smov %s790_s4 }
 0x2c5   : > { %s954_s12 = smov %s656_s13  ;;  %s955_s13 = smov %s660_s14 }
 0x2c6   : > { %s956_s14 = smov %s793_s5  ;;  %s957_s15 = smov %s672_s17 }
 0x2c7   : > { %s958_s16 = smov %s676_s18  ;;  %s959_s17 = smov %s962_s22 }
 0x2c8   : > { %s960_s18 = smov %s950_s3  ;;  %17 = sbr.rel (!%p15_p13) target bundleno = 9 (0x9), region = 84 }
 0x2cf   :  { %309 = vsyncpa [#allocation5], 1 }
 0x2d0   :  { %311 = vsyncpa [#allocation5 + $0x1], 1 }
 0x2d1   :  { %312 = vsyncpa [#allocation6], 1 }
 0x2d2   :  { %314 = vsyncpa [#allocation6 + $0x1], 1 }

</bundles_post_ra>
